<compile_context>
chip_gen: v7x
topology: tpu7x:2x2x1
jax: 0.10.0
libtpu: 0.0.40
codegen_flags: <defaults>
</compile_context>

<pallas_src>
import jax
import jax.numpy as jnp
from jax.experimental import pallas as pl
from jax.experimental.pallas import tpu as pltpu

IN_FEATS = 28 * 28      # 784
HIDDEN = 256
OUT_FEATS = 10
OUT_PAD = 128           # lane-dense padded output width
MAX_TILE_B = 512        # largest batch tile (keeps double-buffered x tile < 1.6 MiB)


def _round_up(x, m):
    return ((x + m - 1) // m) * m


def mlp_kernel(x_ref, w1_ref, b1_ref, w2_ref, b2_ref, w3_ref, b3_ref, o_ref):
    # x tile: (tile_b, 784) bf16; weights bf16; biases f32; accumulation f32.
    x = x_ref[...]
    h1 = jnp.dot(x, w1_ref[...], preferred_element_type=jnp.float32) + b1_ref[...]
    h1 = jnp.maximum(h1, 0.0)                                   # ReLU in f32 (VPU)
    h2 = jnp.dot(h1.astype(jnp.bfloat16), w2_ref[...],
                 preferred_element_type=jnp.float32) + b2_ref[...]
    h2 = jnp.maximum(h2, 0.0)                                   # ReLU in f32
    logits = jnp.dot(h2.astype(jnp.bfloat16), w3_ref[...],
                     preferred_element_type=jnp.float32) + b3_ref[...]
    o_ref[...] = logits                                         # (tile_b, 128) f32, unmasked vst


def neural_network_forward(x_nchw, params):
    """Forward pass matching NeuralNetwork.forward. x_nchw: (B, 1, 28, 28) f32."""
    B = x_nchw.shape[0]
    x_flat = x_nchw.reshape(B, IN_FEATS).astype(jnp.bfloat16)   # nn.Flatten() + bf16 MXU LHS

    # Adaptive batch tile: multiple of 16 (bf16 sublane packing), capped at MAX_TILE_B.
    tile_b = min(MAX_TILE_B, _round_up(B, 16))
    B_pad = _round_up(B, tile_b)
    n_tiles = B_pad // tile_b
    if B_pad != B:
        x_flat = jnp.pad(x_flat, ((0, B_pad - B), (0, 0)))      # dead rows, sliced off below

    w1, b1, w2, b2, w3, b3 = params
    # bf16 weights (MXU operands, half HBM traffic); f32 biases added to the f32 accumulator.
    w1b = w1.astype(jnp.bfloat16)
    w2b = w2.astype(jnp.bfloat16)
    w3b = jnp.pad(w3, ((0, 0), (0, OUT_PAD - OUT_FEATS))).astype(jnp.bfloat16)
    b3p = jnp.pad(b3, ((0, 0), (0, OUT_PAD - OUT_FEATS)))

    out = pl.pallas_call(
        mlp_kernel,
        out_shape=jax.ShapeDtypeStruct((B_pad, OUT_PAD), jnp.float32),
        grid=(n_tiles,),
        in_specs=[
            pl.BlockSpec((tile_b, IN_FEATS), lambda i: (i, 0)),   # x: tiled over batch
            pl.BlockSpec((IN_FEATS, HIDDEN), lambda i: (0, 0)),   # w1: VMEM-resident
            pl.BlockSpec((1, HIDDEN), lambda i: (0, 0)),          # b1
            pl.BlockSpec((HIDDEN, HIDDEN), lambda i: (0, 0)),     # w2
            pl.BlockSpec((1, HIDDEN), lambda i: (0, 0)),          # b2
            pl.BlockSpec((HIDDEN, OUT_PAD), lambda i: (0, 0)),    # w3 (lane-padded)
            pl.BlockSpec((1, OUT_PAD), lambda i: (0, 0)),         # b3 (lane-padded)
        ],
        out_specs=pl.BlockSpec((tile_b, OUT_PAD), lambda i: (i, 0)),
        compiler_params=pltpu.CompilerParams(
            dimension_semantics=("parallel",),                     # megacore sharding on v7x
        ),
    )(x_flat, w1b, b1, w2b, b2, w3b, b3p)

    return out[:B, :OUT_FEATS]                                     # slice off pad rows / lanes


def init_params(key):
    """Deterministic synthetic init (PyTorch-style uniform). Weights (in, out); biases (1, out)."""
    k1, k2, k3, k4, k5, k6 = jax.random.split(key, 6)

    def uniform(k, shape, fan_in):
        bound = 1.0 / jnp.sqrt(fan_in)
        return jax.random.uniform(k, shape, jnp.float32, -bound, bound)

    w1 = uniform(k1, (IN_FEATS, HIDDEN), float(IN_FEATS))
    b1 = uniform(k2, (1, HIDDEN), float(IN_FEATS))
    w2 = uniform(k3, (HIDDEN, HIDDEN), float(HIDDEN))
    b2 = uniform(k4, (1, HIDDEN), float(HIDDEN))
    w3 = uniform(k5, (HIDDEN, OUT_FEATS), float(HIDDEN))
    b3 = uniform(k6, (1, OUT_FEATS), float(HIDDEN))
    return (w1, b1, w2, b2, w3, b3)


def reference_forward(x_nchw, params):
    """Pure-JAX f32 reference for correctness check."""
    w1, b1, w2, b2, w3, b3 = params
    x = x_nchw.reshape(x_nchw.shape[0], -1)
    h1 = jnp.maximum(x @ w1 + b1, 0.0)
    h2 = jnp.maximum(h1 @ w2 + b2, 0.0)
    return h2 @ w3 + b3


if __name__ == "__main__":
    key = jax.random.PRNGKey(0)
    k_x, k_p = jax.random.split(key)

    B = 8
    x = jax.random.normal(k_x, (B, 1, 28, 28), dtype=jnp.float32)  # NCHW like MNIST
    params = init_params(k_p)

    out = neural_network_forward(x, params)
    out = jax.block_until_ready(out)

    ref = reference_forward(x, params)
    assert out.shape == (B, OUT_FEATS)
    # bf16 matmul operands with f32 accumulation -> loosened tolerance vs f32 reference.
    assert jnp.allclose(out, ref, atol=2e-2, rtol=2e-2)

    print("KERNEL_OK")
</pallas_src>

<mosaic_0001>
module attributes {stable_mosaic.version = 11 : i64} {
  func.func @mlp_kernel(%arg0: i32, %arg1: memref<16x784xbf16, #tpu.memory_space<vmem>>, %arg2: memref<784x256xbf16, #tpu.memory_space<vmem>>, %arg3: memref<1x256xf32, #tpu.memory_space<vmem>>, %arg4: memref<256x256xbf16, #tpu.memory_space<vmem>>, %arg5: memref<1x256xf32, #tpu.memory_space<vmem>>, %arg6: memref<256x128xbf16, #tpu.memory_space<vmem>>, %arg7: memref<1x128xf32, #tpu.memory_space<vmem>>, %arg8: memref<16x128xf32, #tpu.memory_space<vmem>>) attributes {dimension_semantics = [#tpu.dimension_semantics<parallel>], iteration_bounds = array<i64: 1>, scalar_prefetch = 0 : i64, scratch_operands = 0 : i64, tpu.core_type = #tpu.core_type<tc>, window_params = [{transform_indices = @transform_0, window_bounds = array<i64: 16, 784>}, {pipeline_mode = #tpu.pipeline_mode<synchronous>, transform_indices = @transform_1, window_bounds = array<i64: 784, 256>}, {pipeline_mode = #tpu.pipeline_mode<synchronous>, transform_indices = @transform_2, window_bounds = array<i64: 1, 256>}, {pipeline_mode = #tpu.pipeline_mode<synchronous>, transform_indices = @transform_3, window_bounds = array<i64: 256, 256>}, {pipeline_mode = #tpu.pipeline_mode<synchronous>, transform_indices = @transform_4, window_bounds = array<i64: 1, 256>}, {pipeline_mode = #tpu.pipeline_mode<synchronous>, transform_indices = @transform_5, window_bounds = array<i64: 256, 128>}, {pipeline_mode = #tpu.pipeline_mode<synchronous>, transform_indices = @transform_6, window_bounds = array<i64: 1, 128>}, {transform_indices = @transform_7, window_bounds = array<i64: 16, 128>}]} {
    %c0 = arith.constant 0 : index
    %c0_0 = arith.constant 0 : index
    %0 = vector.load %arg1[%c0, %c0_0] : memref<16x784xbf16, #tpu.memory_space<vmem>>, vector<16x784xbf16>
    %c0_1 = arith.constant 0 : index
    %c0_2 = arith.constant 0 : index
    %1 = vector.load %arg2[%c0_1, %c0_2] : memref<784x256xbf16, #tpu.memory_space<vmem>>, vector<784x256xbf16>
    %cst = arith.constant dense<0.000000e+00> : vector<16x256xf32>
    %2 = tpu.matmul %0, %1, %cst {dimension_numbers = #tpu.dot_dimension_numbers<[1], [0], [0], [1], [0, 0, 1, 1], [], []>} : vector<16x784xbf16>, vector<784x256xbf16>, vector<16x256xf32> -> vector<16x256xf32>
    %c0_3 = arith.constant 0 : index
    %c0_4 = arith.constant 0 : index
    %3 = vector.load %arg3[%c0_3, %c0_4] : memref<1x256xf32, #tpu.memory_space<vmem>>, vector<1x256xf32>
    %4 = vector.broadcast %3 : vector<1x256xf32> to vector<16x256xf32>
    %5 = arith.addf %2, %4 : vector<16x256xf32>
    %cst_5 = arith.constant 0.000000e+00 : f32
    %6 = vector.broadcast %cst_5 : f32 to vector<16x256xf32>
    %7 = arith.maximumf %5, %6 : vector<16x256xf32>
    %8 = arith.truncf %7 : vector<16x256xf32> to vector<16x256xbf16>
    %c0_6 = arith.constant 0 : index
    %c0_7 = arith.constant 0 : index
    %9 = vector.load %arg4[%c0_6, %c0_7] : memref<256x256xbf16, #tpu.memory_space<vmem>>, vector<256x256xbf16>
    %cst_8 = arith.constant dense<0.000000e+00> : vector<16x256xf32>
    %10 = tpu.matmul %8, %9, %cst_8 {dimension_numbers = #tpu.dot_dimension_numbers<[1], [0], [0], [1], [0, 0, 1, 1], [], []>} : vector<16x256xbf16>, vector<256x256xbf16>, vector<16x256xf32> -> vector<16x256xf32>
    %c0_9 = arith.constant 0 : index
    %c0_10 = arith.constant 0 : index
    %11 = vector.load %arg5[%c0_9, %c0_10] : memref<1x256xf32, #tpu.memory_space<vmem>>, vector<1x256xf32>
    %12 = vector.broadcast %11 : vector<1x256xf32> to vector<16x256xf32>
    %13 = arith.addf %10, %12 : vector<16x256xf32>
    %cst_11 = arith.constant 0.000000e+00 : f32
    %14 = vector.broadcast %cst_11 : f32 to vector<16x256xf32>
    %15 = arith.maximumf %13, %14 : vector<16x256xf32>
    %16 = arith.truncf %15 : vector<16x256xf32> to vector<16x256xbf16>
    %c0_12 = arith.constant 0 : index
    %c0_13 = arith.constant 0 : index
    %17 = vector.load %arg6[%c0_12, %c0_13] : memref<256x128xbf16, #tpu.memory_space<vmem>>, vector<256x128xbf16>
    %cst_14 = arith.constant dense<0.000000e+00> : vector<16x128xf32>
    %18 = tpu.matmul %16, %17, %cst_14 {dimension_numbers = #tpu.dot_dimension_numbers<[1], [0], [0], [1], [0, 0, 1, 1], [], []>} : vector<16x256xbf16>, vector<256x128xbf16>, vector<16x128xf32> -> vector<16x128xf32>
    %c0_15 = arith.constant 0 : index
    %c0_16 = arith.constant 0 : index
    %19 = vector.load %arg7[%c0_15, %c0_16] : memref<1x128xf32, #tpu.memory_space<vmem>>, vector<1x128xf32>
    %20 = vector.broadcast %19 : vector<1x128xf32> to vector<16x128xf32>
    %21 = arith.addf %18, %20 : vector<16x128xf32>
    %c0_17 = arith.constant 0 : index
    %c0_18 = arith.constant 0 : index
    %22 = vector.load %arg8[%c0_17, %c0_18] : memref<16x128xf32, #tpu.memory_space<vmem>>, vector<16x128xf32>
    tpu.vector_store %arg8[%c0_17, %c0_18], %21 {strides = array<i32>} : memref<16x128xf32, #tpu.memory_space<vmem>>, vector<16x128xf32>,
    return
  }
  func.func @transform_0(%arg0: i32) -> (i32, i32) {
    %c0_i32 = arith.constant 0 : i32
    %c0_i32_0 = arith.constant 0 : i32
    return %arg0, %c0_i32 : i32, i32
  }
  func.func @transform_1(%arg0: i32) -> (i32, i32) {
    %c0_i32 = arith.constant 0 : i32
    %c0_i32_0 = arith.constant 0 : i32
    %c0_i32_1 = arith.constant 0 : i32
    return %c0_i32, %c0_i32_0 : i32, i32
  }
  func.func @transform_2(%arg0: i32) -> (i32, i32) {
    %c0_i32 = arith.constant 0 : i32
    %c0_i32_0 = arith.constant 0 : i32
    %c0_i32_1 = arith.constant 0 : i32
    return %c0_i32, %c0_i32_0 : i32, i32
  }
  func.func @transform_3(%arg0: i32) -> (i32, i32) {
    %c0_i32 = arith.constant 0 : i32
    %c0_i32_0 = arith.constant 0 : i32
    %c0_i32_1 = arith.constant 0 : i32
    return %c0_i32, %c0_i32_0 : i32, i32
  }
  func.func @transform_4(%arg0: i32) -> (i32, i32) {
    %c0_i32 = arith.constant 0 : i32
    %c0_i32_0 = arith.constant 0 : i32
    %c0_i32_1 = arith.constant 0 : i32
    return %c0_i32, %c0_i32_0 : i32, i32
  }
  func.func @transform_5(%arg0: i32) -> (i32, i32) {
    %c0_i32 = arith.constant 0 : i32
    %c0_i32_0 = arith.constant 0 : i32
    %c0_i32_1 = arith.constant 0 : i32
    return %c0_i32, %c0_i32_0 : i32, i32
  }
  func.func @transform_6(%arg0: i32) -> (i32, i32) {
    %c0_i32 = arith.constant 0 : i32
    %c0_i32_0 = arith.constant 0 : i32
    %c0_i32_1 = arith.constant 0 : i32
    return %c0_i32, %c0_i32_0 : i32, i32
  }
  func.func @transform_7(%arg0: i32) -> (i32, i32) {
    %c0_i32 = arith.constant 0 : i32
    %c0_i32_0 = arith.constant 0 : i32
    return %arg0, %c0_i32 : i32, i32
  }
}

</mosaic_0001>

<bundles_post_ra>
// kernel: tpu_custom_call.1
= control target key start
LH: loop header
LB: loop body
LE: loop exit
PB: predicated region body
PF: predicated region fallthrough
CT: control target
= control target key end

     0   :  { %12 = vsyncpa [#allocation3], 0  ;;  %s2039_s0 = inlined_call_operand.hbm [shape: bf16[16,784], index: 0, kind: input, shape index: {}]   ;;  %s2040_s1 = inlined_call_operand.hbm [shape: bf16[784,256], index: 1, kind: input, shape index: {}]   ;;  %s2041_s2 = inlined_call_operand.vmem [shape: f32[1,256], index: 2, kind: input, shape index: {}]   ;;  %s2042_s3 = inlined_call_operand.hbm [shape: bf16[256,256], index: 3, kind: input, shape index: {}]   ;;  %s2043_s4 = inlined_call_operand.vmem [shape: f32[1,256], index: 4, kind: input, shape index: {}]   ;;  %s2044_s5 = inlined_call_operand.hbm [shape: bf16[256,128], index: 5, kind: input, shape index: {}]   ;;  %s2045_s6 = inlined_call_operand.vmem [shape: f32[1,128], index: 6, kind: input, shape index: {}]   ;;  %s2046_s7 = inlined_call_operand.hbm [shape: f32[16,128], index: 7, kind: output, shape index: {}]  }
   0x1   :  { %13 = vsyncpa [#allocation6], 0 }
   0x2   :  { %14 = vsyncpa [#allocation9], 0 }
   0x3   :  { %15 = vsyncpa [#allocation4], 0  ;;  %s1902_s24 = smov [#allocation5]   ;;  %s1784_s28 = scalar_lea.hbm %s2040_s1, 12544 }
   0x4   :  { %s33_s25 = sshll.u32 %s1902_s24, 4  ;;  %p1785_p0 = scmp.ne.s32.totalorder %s2040_s1, %s1784_s28  ;;  %s34_s25 = int_to_ptr.vmem [resolvable:$true] %s33_s25 }
   0x5   :  { %p1788_p1 = scmp.lt.u32.totalorder %s1784_s28, %s2040_s1 }
   0x7   :  { %p1790_p2 = pnand %p1788_p1, %p1785_p0 }
   0x9   :  { %1793 = shalt.err (!%p1790_p2)
}
   0xa   :  { %s1794_s10 = scalar_lea.vmem %s34_s25, 12544  ;;  %p1799_p4 = scmp.lt.s32.totalorder %s34_s25, %s34_s25 }
   0xb   :  { %p1795_p3 = scmp.ne.s32.totalorder %s34_s25, %s1794_s10  ;;  %p1800_p5 = scmp.lt.s32.totalorder %s1794_s10, %s1794_s10 }
   0xd   :  { %p1801_p6 = por %p1800_p5, %p1799_p4 }
   0xf   :  { %p1802_p7 = pnand %p1801_p6, %p1795_p3 }
  0x11   :  { %1805 = shalt.err (!%p1802_p7)
}
  0x12   :  { %s1903_s11 = smov 128   ;;  %s1904_s12 = smov 8  }
  0x13   :  { %39 = dma.hbm_to_vmem [thread:$0]  %s2040_s1, 12544, %s34_s25, [#allocation6], %s1903_s11, %s1903_s11, %s1904_s12  }
  0x14   :  { %s1905_s15 = smov [#allocation2]   ;;  %s1806_s19 = scalar_lea.hbm %s2039_s0, 896 }
  0x15   :  { %s21_s16 = sshll.u32 %s1905_s15, 4  ;;  %p1807_p8 = scmp.ne.s32.totalorder %s2039_s0, %s1806_s19  ;;  %s22_s16 = int_to_ptr.vmem [resolvable:$true] %s21_s16 }
  0x16   :  { %p1810_p9 = scmp.lt.u32.totalorder %s1806_s19, %s2039_s0 }
  0x18   :  { %p1812_p10 = pnand %p1810_p9, %p1807_p8 }
  0x1a   :  { %1815 = shalt.err (!%p1812_p10)
}
  0x1b   :  { %s1816_s24 = scalar_lea.vmem %s22_s16, 896  ;;  %p1821_p12 = scmp.lt.s32.totalorder %s22_s16, %s22_s16 }
  0x1c   :  { %p1817_p11 = scmp.ne.s32.totalorder %s22_s16, %s1816_s24  ;;  %p1822_p13 = scmp.lt.s32.totalorder %s1816_s24, %s1816_s24 }
  0x1e   :  { %p1823_p0 = por %p1822_p13, %p1821_p12 }
  0x20   :  { %p1824_p1 = pnand %p1823_p0, %p1817_p11 }
  0x22   :  { %1827 = shalt.err (!%p1824_p1)
}
  0x23   :  { %s1906_s1 = smov 448   ;;  %s1907_s25 = smov 28  }
  0x24   :  { %27 = dma.hbm_to_vmem [thread:$0]  %s2039_s0, 896, %s22_s16, [#allocation3], %s1906_s1, %s1906_s1, %s1907_s25  }
  0x25   :  { %s1908_s28 = smov [#allocation7]   ;;  %s1909_s30 = smov [#allocation8]  }
  0x26   :  { %s47_s29 = sshll.u32 %s1908_s28, 4  ;;  %s61_s8 = sshll.u32 %s1909_s30, 4  ;;  %s48_s29 = int_to_ptr.vmem [resolvable:$true] %s47_s29  ;;  %s1981_s8 = int_to_ptr.vmem [resolvable:$true] %s61_s8 }
  0x27   :  { %s1828_s13 = scalar_lea.hbm %s2042_s3, 4096 }
  0x28   :  { %p1829_p2 = scmp.ne.s32.totalorder %s2042_s3, %s1828_s13  ;;  %p1832_p3 = scmp.lt.u32.totalorder %s1828_s13, %s2042_s3 }
  0x2a   :  { %p1834_p4 = pnand %p1832_p3, %p1829_p2 }
  0x2c   :  { %1837 = shalt.err (!%p1834_p4)
}
  0x2d   :  { %s1838_s0 = scalar_lea.vmem %s48_s29, 4096  ;;  %p1843_p6 = scmp.lt.s32.totalorder %s48_s29, %s48_s29 }
  0x2e   :  { %p1839_p5 = scmp.ne.s32.totalorder %s48_s29, %s1838_s0  ;;  %p1844_p7 = scmp.lt.s32.totalorder %s1838_s0, %s1838_s0 }
  0x30   :  { %p1845_p8 = por %p1844_p7, %p1843_p6 }
  0x32   :  { %p1846_p9 = pnand %p1845_p8, %p1839_p5 }
  0x34   :  { %1849 = shalt.err (!%p1846_p9)
}
  0x35   :  { %53 = dma.hbm_to_vmem [thread:$0]  %s2042_s3, 4096, %s48_s29, [#allocation6], %s1903_s11, %s1903_s11, %s1904_s12  }
  0x36   :  { %s1850_s22 = scalar_lea.hbm %s2044_s5, 2048 }
  0x37   :  { %p1851_p10 = scmp.ne.s32.totalorder %s2044_s5, %s1850_s22  ;;  %p1854_p11 = scmp.lt.u32.totalorder %s1850_s22, %s2044_s5 }
  0x39   :  { %p1856_p12 = pnand %p1854_p11, %p1851_p10 }
  0x3b   :  { %1859 = shalt.err (!%p1856_p12)
}
  0x3c   :  { %s1860_s26 = scalar_lea.vmem %s1981_s8, 2048  ;;  %p1865_p0 = scmp.lt.s32.totalorder %s1981_s8, %s1981_s8 }
  0x3d   :  { %p1861_p13 = scmp.ne.s32.totalorder %s1981_s8, %s1860_s26  ;;  %p1866_p1 = scmp.lt.s32.totalorder %s1860_s26, %s1860_s26 }
  0x3f   :  { %p1867_p2 = por %p1866_p1, %p1865_p0 }
  0x41   :  { %p1868_p3 = pnand %p1867_p2, %p1861_p13 }
  0x43   :  { %1871 = shalt.err (!%p1868_p3)
}
  0x44   :  { %s1910_s3 = smov 64   ;;  %s1911_s27 = smov 4  }
  0x45   :  { %67 = dma.hbm_to_vmem [thread:$0]  %s2044_s5, 2048, %s1981_s8, [#allocation9], %s1910_s3, %s1910_s3, %s1911_s27  }
  0x46   :  { %1894 = dma.done.wait [#allocation3], 896  }
  0x47   :  { %1895 = vsyncadd [#allocation3], 4294966400 }
  0x48   :  { %1896 = dma.done.wait [#allocation6], 16640  }
  0x49   :  { %1897 = vsyncadd [#allocation6], 4294950656 }
  0x4a   :  { %1898 = dma.done.wait [#allocation9], 2048  }
  0x4b   :  { %1899 = vsyncadd [#allocation9], 4294965248  ;;  %v1563_v0 = vld [vmem:[#allocation5 + $0x104] ss:$8 sps:$4 sm:$0xff]   ;;  %v1565_v1 = vld [vmem:[#allocation5 + $0x100] ss:$8 sps:$4 sm:$0xff]  }
  0x4c   :  { %773 = vmatprep.subr.bf16.mxu0 %v1563_v0  ;;  %v1566_v2 = vld [vmem:[#allocation5 + $0x114] ss:$8 sps:$4 sm:$0xff]   ;;  %v1568_v3 = vld [vmem:[#allocation5 + $0x110] ss:$8 sps:$4 sm:$0xff]   ;;  %v1569_v4 = vld [vmem:[#allocation5 + $0x124] ss:$8 sps:$4 sm:$0xff]  }
  0x4d   :  { %774 = vmatpush1.bf16.msra.mxu0 %v1565_v1  ;;  %v1571_v5 = vld [vmem:[#allocation5 + $0x120] ss:$8 sps:$4 sm:$0xff]   ;;  %v1572_v6 = vld [vmem:[#allocation5 + $0x134] ss:$8 sps:$4 sm:$0xff]   ;;  %v1574_v7 = vld [vmem:[#allocation5 + $0x130] ss:$8 sps:$4 sm:$0xff]  }
  0x4e   :  { %775 = vmatprep.subr.bf16.mxu0 %v1566_v2  ;;  %v1575_v8 = vld [vmem:[#allocation5 + $0x144] ss:$8 sps:$4 sm:$0xff]   ;;  %v1577_v9 = vld [vmem:[#allocation5 + $0x140] ss:$8 sps:$4 sm:$0xff]   ;;  %v1578_v10 = vld [vmem:[#allocation5 + $0x154] ss:$8 sps:$4 sm:$0xff]  }
  0x4f   :  { %v1580_v11 = vld [vmem:[#allocation5 + $0x150] ss:$8 sps:$4 sm:$0xff]   ;;  %v1581_v12 = vld [vmem:[#allocation5 + $0x164] ss:$8 sps:$4 sm:$0xff]   ;;  %v1583_v14 = vld [vmem:[#allocation5 + $0x160] ss:$8 sps:$4 sm:$0xff]  }
  0x50   :  { %v1613_v13 = vld [vmem:[#allocation2 + $0xc] ss:$28 sps:$4 sm:$0xff]   ;;  %v1620_v16 = vld [vmem:[#allocation5 + $0x4] ss:$8 sps:$4 sm:$0xff]   ;;  %v1625_v19 = vld [vmem:[#allocation5] ss:$8 sps:$4 sm:$0xff]  }
  0x51   :  { %776 = vmatpush1.bf16.msra.mxu0 %v1568_v3  ;;  %v1584_v15 = vld [vmem:[#allocation5 + $0x174] ss:$8 sps:$4 sm:$0xff]   ;;  %805 = vmatprep.mubr.bf16.mxu0 %v1613_v13  ;;  %v1586_v17 = vld [vmem:[#allocation5 + $0x170] ss:$8 sps:$4 sm:$0xff]   ;;  %v1587_v18 = vld [vmem:[#allocation5 + $0x184] ss:$8 sps:$4 sm:$0xff]  }
  0x52   :  { %777 = vmatprep.subr.bf16.mxu0 %v1569_v4  ;;  %730 = vmatprep.subr.bf16.mxu1 %v1620_v16  ;;  %v1626_v20 = vld [vmem:[#allocation5 + $0x14] ss:$8 sps:$4 sm:$0xff]   ;;  %v1589_v21 = vld [vmem:[#allocation5 + $0x180] ss:$8 sps:$4 sm:$0xff]   ;;  %v1631_v22 = vld [vmem:[#allocation5 + $0x10] ss:$8 sps:$4 sm:$0xff]  }
  0x53   :  { %731 = vmatpush1.bf16.msra.mxu1 %v1625_v19  ;;  %v1632_v23 = vld [vmem:[#allocation5 + $0x24] ss:$8 sps:$4 sm:$0xff]   ;;  %v1590_v24 = vld [vmem:[#allocation5 + $0x194] ss:$8 sps:$4 sm:$0xff]   ;;  %v1637_v25 = vld [vmem:[#allocation5 + $0x20] ss:$8 sps:$4 sm:$0xff]  }
  0x54   :  { %732 = vmatprep.subr.bf16.mxu1 %v1626_v20  ;;  %v1638_v26 = vld [vmem:[#allocation5 + $0x34] ss:$8 sps:$4 sm:$0xff]   ;;  %v1592_v27 = vld [vmem:[#allocation5 + $0x190] ss:$8 sps:$4 sm:$0xff]   ;;  %v1593_v28 = vld [vmem:[#allocation5 + $0x1a4] ss:$8 sps:$4 sm:$0xff]  }
  0x55   :  { %778 = vmatpush1.bf16.msra.mxu0 %v1571_v5  ;;  %v1643_v29 = vld [vmem:[#allocation5 + $0x30] ss:$8 sps:$4 sm:$0xff]   ;;  %v1644_v30 = vld [vmem:[#allocation5 + $0x44] ss:$8 sps:$4 sm:$0xff]   ;;  %v1595_v31 = vld [vmem:[#allocation5 + $0x1a0] ss:$8 sps:$4 sm:$0xff]  }
  0x56   :  { %779 = vmatprep.subr.bf16.mxu0 %v1572_v6  ;;  %v1596_v32 = vld [vmem:[#allocation5 + $0x1b4] ss:$8 sps:$4 sm:$0xff]   ;;  %v1649_v33 = vld [vmem:[#allocation5 + $0x40] ss:$8 sps:$4 sm:$0xff]   ;;  %v1598_v35 = vld [vmem:[#allocation5 + $0x1b0] ss:$8 sps:$4 sm:$0xff]  }
  0x57   :  { %733 = vmatpush1.bf16.msra.mxu1 %v1631_v22  ;;  %v1650_v34 = vld [vmem:[#allocation5 + $0x54] ss:$8 sps:$4 sm:$0xff]   ;;  %v1599_v36 = vld [vmem:[#allocation5 + $0x1c4] ss:$8 sps:$4 sm:$0xff]   ;;  %v1655_v37 = vld [vmem:[#allocation5 + $0x50] ss:$8 sps:$4 sm:$0xff]  }
  0x58   :  { %734 = vmatprep.subr.bf16.mxu1 %v1632_v23  ;;  %v1656_v38 = vld [vmem:[#allocation5 + $0x64] ss:$8 sps:$4 sm:$0xff]   ;;  %v1601_v39 = vld [vmem:[#allocation5 + $0x1c0] ss:$8 sps:$4 sm:$0xff]   ;;  %v1602_v40 = vld [vmem:[#allocation5 + $0x1d4] ss:$8 sps:$4 sm:$0xff]  }
  0x59   :  { %780 = vmatpush1.bf16.msra.mxu0 %v1574_v7  ;;  %v1661_v41 = vld [vmem:[#allocation5 + $0x60] ss:$8 sps:$4 sm:$0xff]   ;;  %v1662_v42 = vld [vmem:[#allocation5 + $0x74] ss:$8 sps:$4 sm:$0xff]   ;;  %v1604_v43 = vld [vmem:[#allocation5 + $0x1d0] ss:$8 sps:$4 sm:$0xff]  }
  0x5a   :  { %781 = vmatprep.subr.bf16.mxu0 %v1575_v8  ;;  %v1605_v44 = vld [vmem:[#allocation5 + $0x1e4] ss:$8 sps:$4 sm:$0xff]   ;;  %v1667_v45 = vld [vmem:[#allocation5 + $0x70] ss:$8 sps:$4 sm:$0xff]   ;;  %v1607_v47 = vld [vmem:[#allocation5 + $0x1e0] ss:$8 sps:$4 sm:$0xff]  }
  0x5b   :  { %735 = vmatpush1.bf16.msra.mxu1 %v1637_v25  ;;  %v1668_v46 = vld [vmem:[#allocation5 + $0x84] ss:$8 sps:$4 sm:$0xff]   ;;  %v1608_v48 = vld [vmem:[#allocation5 + $0x1f4] ss:$8 sps:$4 sm:$0xff]   ;;  %v1673_v49 = vld [vmem:[#allocation5 + $0x80] ss:$8 sps:$4 sm:$0xff]  }
  0x5c   :  { %736 = vmatprep.subr.bf16.mxu1 %v1638_v26  ;;  %v1674_v50 = vld [vmem:[#allocation5 + $0x94] ss:$8 sps:$4 sm:$0xff]   ;;  %v1610_v51 = vld [vmem:[#allocation5 + $0x1f0] ss:$8 sps:$4 sm:$0xff]   ;;  %v1616_v52 = vld [vmem:[#allocation5 + $0x204] ss:$8 sps:$4 sm:$0xff]  }
  0x5d   :  { %782 = vmatpush1.bf16.msra.mxu0 %v1577_v9  ;;  %v1679_v53 = vld [vmem:[#allocation5 + $0x90] ss:$8 sps:$4 sm:$0xff]   ;;  %v1680_v55 = vld [vmem:[#allocation5 + $0xa4] ss:$8 sps:$4 sm:$0xff]   ;;  %v1614_v56 = vld [vmem:[#allocation5 + $0x200] ss:$8 sps:$4 sm:$0xff]  }
  0x5e   :  { %783 = vmatprep.subr.bf16.mxu0 %v1578_v10  ;;  %v1611_v54 = vld [vmem:[#allocation2 + $0x8] ss:$28 sps:$4 sm:$0xff]   ;;  %v1706_v57 = vld [vmem:[#allocation2 + $0x14] ss:$28 sps:$4 sm:$0xff]   ;;  %v1685_v59 = vld [vmem:[#allocation5 + $0xa0] ss:$8 sps:$4 sm:$0xff]  }
  0x5f   :  { %737 = vmatpush1.bf16.msra.mxu1 %v1643_v29  ;;  %v1619_v58 = vld [vmem:[#allocation5 + $0x214] ss:$8 sps:$4 sm:$0xff]   ;;  %v1617_v61 = vld [vmem:[#allocation5 + $0x210] ss:$8 sps:$4 sm:$0xff]   ;;  %v1624_v62 = vld [vmem:[#allocation5 + $0x224] ss:$8 sps:$4 sm:$0xff]  }
  0x60   :  { %738 = vmatprep.subr.bf16.mxu1 %v1644_v30  ;;  %v1686_v60 = vld [vmem:[#allocation5 + $0xb4] ss:$8 sps:$4 sm:$0xff]   ;;  %v1691_v63 = vld [vmem:[#allocation5 + $0xb0] ss:$8 sps:$4 sm:$0xff]   ;;  %v1718_v0 = vld [vmem:[#allocation2 + $0x4] ss:$28 sps:$4 sm:$0xff]  }
  0x61   :  { %784 = vmatpush1.bf16.msra.mxu0 %v1580_v11  ;;  %v1692_v1 = vld [vmem:[#allocation5 + $0xc4] ss:$8 sps:$4 sm:$0xff]   ;;  %v1622_v2 = vld [vmem:[#allocation5 + $0x220] ss:$8 sps:$4 sm:$0xff]   ;;  %762 = vmatprep.mubr.bf16.mxu1 %v1718_v0  ;;  %v1630_v3 = vld [vmem:[#allocation5 + $0x234] ss:$8 sps:$4 sm:$0xff]  }
  0x62   :  { %785 = vmatprep.subr.bf16.mxu0 %v1581_v12  ;;  %v1697_v4 = vld [vmem:[#allocation5 + $0xc0] ss:$8 sps:$4 sm:$0xff]   ;;  %v1698_v5 = vld [vmem:[#allocation5 + $0xd4] ss:$8 sps:$4 sm:$0xff]   ;;  %v1628_v6 = vld [vmem:[#allocation5 + $0x230] ss:$8 sps:$4 sm:$0xff]  }
  0x63   :  { %739 = vmatpush1.bf16.msra.mxu1 %v1649_v33  ;;  %v1636_v7 = vld [vmem:[#allocation5 + $0x244] ss:$8 sps:$4 sm:$0xff]   ;;  %v1703_v8 = vld [vmem:[#allocation5 + $0xd0] ss:$8 sps:$4 sm:$0xff]   ;;  %v1634_v10 = vld [vmem:[#allocation5 + $0x240] ss:$8 sps:$4 sm:$0xff]  }
  0x64   :  { %740 = vmatprep.subr.bf16.mxu1 %v1650_v34  ;;  %v1707_v9 = vld [vmem:[#allocation5 + $0xe4] ss:$8 sps:$4 sm:$0xff]   ;;  %v1642_v11 = vld [vmem:[#allocation5 + $0x254] ss:$8 sps:$4 sm:$0xff]   ;;  %v1712_v12 = vld [vmem:[#allocation5 + $0xe0] ss:$8 sps:$4 sm:$0xff]  }
  0x65   :  { %786 = vmatpush1.bf16.msra.mxu0 %v1583_v14  ;;  %v1713_v13 = vld [vmem:[#allocation5 + $0xf4] ss:$8 sps:$4 sm:$0xff]   ;;  %v1640_v14 = vld [vmem:[#allocation5 + $0x250] ss:$8 sps:$4 sm:$0xff]   ;;  %v1646_v16 = vld [vmem:[#allocation5 + $0x260] ss:$8 sps:$4 sm:$0xff]  }
  0x66   :  { %787 = vmatprep.subr.bf16.mxu0 %v1584_v15  ;;  %v1648_v15 = vld [vmem:[#allocation5 + $0x264] ss:$8 sps:$4 sm:$0xff]   ;;  %v1654_v19 = vld [vmem:[#allocation5 + $0x274] ss:$8 sps:$4 sm:$0xff]   ;;  %v1652_v23 = vld [vmem:[#allocation5 + $0x270] ss:$8 sps:$4 sm:$0xff]  }
  0x67   :  { %741 = vmatpush1.bf16.msra.mxu1 %v1655_v37  ;;  %v1716_v20 = vld [vmem:[#allocation2] ss:$28 sps:$4 sm:$0xff]   ;;  %v1728_v26 = vld [vmem:[#allocation7 + $0x24] ss:$8 sps:$4 sm:$0xff]   ;;  %v1726_v29 = vld [vmem:[#allocation7 + $0x20] ss:$8 sps:$4 sm:$0xff]  }
  0x68   :  { %742 = vmatprep.subr.bf16.mxu1 %v1656_v38  ;;  %v1725_v22 = vld [vmem:[#allocation7 + $0x14] ss:$8 sps:$4 sm:$0xff]   ;;  %v1723_v25 = vld [vmem:[#allocation7 + $0x10] ss:$8 sps:$4 sm:$0xff]   ;;  %v1734_v34 = vld [vmem:[#allocation7 + $0x44] ss:$8 sps:$4 sm:$0xff]  }
  0x69   :  { %788 = vmatpush1.bf16.msra.mxu0 %v1586_v17  ;;  %v1715_v17 = vld [vmem:[#allocation5 + $0xf0] ss:$8 sps:$4 sm:$0xff]   ;;  %v1731_v30 = vld [vmem:[#allocation7 + $0x34] ss:$8 sps:$4 sm:$0xff]   ;;  %v1729_v33 = vld [vmem:[#allocation7 + $0x30] ss:$8 sps:$4 sm:$0xff]  }
  0x6a   :  { %789 = vmatprep.subr.bf16.mxu0 %v1587_v18  ;;  %v1722_v18 = vld [vmem:[#allocation7 + $0x4] ss:$8 sps:$4 sm:$0xff]   ;;  %v1732_v37 = vld [vmem:[#allocation7 + $0x40] ss:$8 sps:$4 sm:$0xff]   ;;  %v1737_v38 = vld [vmem:[#allocation7 + $0x54] ss:$8 sps:$4 sm:$0xff]  }
  0x6b   :  { %743 = vmatpush1.bf16.msra.mxu1 %v1661_v41  ;;  %v1735_v41 = vld [vmem:[#allocation7 + $0x50] ss:$8 sps:$4 sm:$0xff]   ;;  %vm726_vm0 = vcmask 130048   ;;  %s1913_s10 = smov [#allocation10]  }
  0x6c   :  { %744 = vmatprep.subr.bf16.mxu1 %v1662_v42  ;;  %v1740_v42 = vld [vmem:[#allocation7 + $0x64] ss:$8 sps:$4 sm:$0xff]   ;;  %v1753_v0 = vld [vmem:[#allocation7 + $0xb0] ss:$8 sps:$4 sm:$0xff]   ;;  %s1344_s13 = sshll.u32 %s1913_s10, 4  ;;  %s1345_s13 = int_to_ptr.vmem [resolvable:$true] %s1344_s13 }
  0x6d   :  { %790 = vmatpush1.bf16.msra.mxu0 %v1589_v21  ;;  %v1720_v21 = vld [vmem:[#allocation7] ss:$8 sps:$4 sm:$0xff]   ;;  %s1872_s14 = scalar_lea.vmem %s1345_s13, 256  ;;  %p1877_p5 = scmp.lt.s32.totalorder %s1345_s13, %s1345_s13 }
  0x6e   :  { %791 = vmatprep.subr.bf16.mxu0 %v1590_v24  ;;  %v1660_v24 = vld [vmem:[#allocation5 + $0x284] ss:$8 sps:$4 sm:$0xff]   ;;  %p1873_p4 = scmp.ne.s32.totalorder %s1345_s13, %s1872_s14  ;;  %p1878_p6 = scmp.lt.s32.totalorder %s1872_s14, %s1872_s14 }
  0x6f   :  { %745 = vmatpush1.bf16.msra.mxu1 %v1667_v45  ;;  %v1738_v45 = vld [vmem:[#allocation7 + $0x60] ss:$8 sps:$4 sm:$0xff]  }
  0x70   :  { %746 = vmatprep.subr.bf16.mxu1 %v1668_v46  ;;  %v1743_v46 = vld [vmem:[#allocation7 + $0x74] ss:$8 sps:$4 sm:$0xff]   ;;  %p1879_p7 = por %p1878_p6, %p1877_p5 }
  0x71   :  { %792 = vmatpush1.bf16.msra.mxu0 %v1592_v27  ;;  %v1658_v27 = vld [vmem:[#allocation5 + $0x280] ss:$8 sps:$4 sm:$0xff]  }
  0x72   :  { %793 = vmatprep.subr.bf16.mxu0 %v1593_v28  ;;  %v1666_v28 = vld [vmem:[#allocation5 + $0x294] ss:$8 sps:$4 sm:$0xff]   ;;  %p1880_p8 = pnand %p1879_p7, %p1873_p4 }
  0x73   :  { %747 = vmatpush1.bf16.msra.mxu1 %v1673_v49  ;;  %v1741_v49 = vld [vmem:[#allocation7 + $0x70] ss:$8 sps:$4 sm:$0xff]  }
  0x74   :  { %748 = vmatprep.subr.bf16.mxu1 %v1674_v50  ;;  %v1746_v50 = vld [vmem:[#allocation7 + $0x84] ss:$8 sps:$4 sm:$0xff]  }
  0x75   :  { %794 = vmatpush1.bf16.msra.mxu0 %v1595_v31  ;;  %v1664_v31 = vld [vmem:[#allocation5 + $0x290] ss:$8 sps:$4 sm:$0xff]  }
  0x76   :  { %795 = vmatprep.subr.bf16.mxu0 %v1596_v32  ;;  %v1672_v32 = vld [vmem:[#allocation5 + $0x2a4] ss:$8 sps:$4 sm:$0xff]  }
  0x77   :  { %749 = vmatpush1.bf16.msra.mxu1 %v1679_v53  ;;  %v1744_v53 = vld [vmem:[#allocation7 + $0x80] ss:$8 sps:$4 sm:$0xff]  }
  0x78   :  { %750 = vmatprep.subr.bf16.mxu1 %v1680_v55  ;;  %v1700_v55 = vld [vmem:[#allocation5 + $0x2f0] ss:$8 sps:$4 sm:$0xff]  }
  0x79   :  { %796 = vmatpush1.bf16.msra.mxu0 %v1598_v35  ;;  %v1670_v35 = vld [vmem:[#allocation5 + $0x2a0] ss:$8 sps:$4 sm:$0xff]  }
  0x7a   :  { %797 = vmatprep.subr.bf16.mxu0 %v1599_v36  ;;  %v1678_v36 = vld [vmem:[#allocation5 + $0x2b4] ss:$8 sps:$4 sm:$0xff]  }
  0x7b   :  { %751 = vmatpush1.bf16.msra.mxu1 %v1685_v59  ;;  %v1752_v59 = vld [vmem:[#allocation7 + $0xa4] ss:$8 sps:$4 sm:$0xff]  }
  0x7c   :  { %752 = vmatprep.subr.bf16.mxu1 %v1686_v60  ;;  %v1709_v60 = vld [vmem:[#allocation5 + $0x300] ss:$8 sps:$4 sm:$0xff]  }
  0x7d   :  { %798 = vmatpush1.bf16.msra.mxu0 %v1601_v39  ;;  %v1676_v39 = vld [vmem:[#allocation5 + $0x2b0] ss:$8 sps:$4 sm:$0xff]  }
  0x7e   :  { %799 = vmatprep.subr.bf16.mxu0 %v1602_v40  ;;  %v1684_v40 = vld [vmem:[#allocation5 + $0x2c4] ss:$8 sps:$4 sm:$0xff]  }
  0x7f   :  { %753 = vmatpush1.bf16.msra.mxu1 %v1691_v63  ;;  %v1912_v63 = vmov 0  }
  0x80   :  { %754 = vmatprep.subr.bf16.mxu1 %v1692_v1  ;;  %v1758_v1 = vld [vmem:[#allocation7 + $0xc4] ss:$8 sps:$4 sm:$0xff]  }
  0x81   :  { %800 = vmatpush1.bf16.msra.mxu0 %v1604_v43  ;;  %v1682_v43 = vld [vmem:[#allocation5 + $0x2c0] ss:$8 sps:$4 sm:$0xff]  }
  0x82   :  { %801 = vmatprep.subr.bf16.mxu0 %v1605_v44  ;;  %v1690_v44 = vld [vmem:[#allocation5 + $0x2d4] ss:$8 sps:$4 sm:$0xff]  }
  0x83   :  { %755 = vmatpush1.bf16.msra.mxu1 %v1697_v4  ;;  %v1759_v4 = vld [vmem:[#allocation7 + $0xd0] ss:$8 sps:$4 sm:$0xff]  }
  0x84   :  { %756 = vmatprep.subr.bf16.mxu1 %v1698_v5  ;;  %v1761_v5 = vld [vmem:[#allocation7 + $0xd4] ss:$8 sps:$4 sm:$0xff]  }
  0x85   :  { %802 = vmatpush1.bf16.msra.mxu0 %v1607_v47  ;;  %v1688_v47 = vld [vmem:[#allocation5 + $0x2d0] ss:$8 sps:$4 sm:$0xff]  }
  0x86   :  { %803 = vmatprep.subr.bf16.mxu0 %v1608_v48  ;;  %v1696_v48 = vld [vmem:[#allocation5 + $0x2e4] ss:$8 sps:$4 sm:$0xff]  }
  0x87   :  { %757 = vmatpush1.bf16.msra.mxu1 %v1703_v8  ;;  %v1767_v8 = vld [vmem:[#allocation7 + $0xf4] ss:$8 sps:$4 sm:$0xff]  }
  0x88   :  { %758 = vmatprep.subr.bf16.mxu1 %v1707_v9  ;;  %v1765_v9 = vld [vmem:[#allocation7 + $0xf0] ss:$8 sps:$4 sm:$0xff]  }
  0x89   :  { %804 = vmatpush1.bf16.msra.mxu0 %v1610_v51  ;;  %v1694_v51 = vld [vmem:[#allocation5 + $0x2e0] ss:$8 sps:$4 sm:$0xff]  }
  0x8a   :  { %816 = vmatprep.subr.bf16.mxu0 %v1616_v52  ;;  %v1702_v52 = vld [vmem:[#allocation5 + $0x2f4] ss:$8 sps:$4 sm:$0xff]  }
  0x8b   :  { %759 = vmatpush1.bf16.msra.mxu1 %v1712_v12 }
  0x8c   :  { %806 = vmatmul.mubr.bf16.vlgmr.msra.gmra.mrb[0].mxu0 %v1611_v54  ;;  %760 = vmatprep.subr.bf16.mxu1 %v1713_v13  ;;  %v1749_v54 = vld [vmem:[#allocation7 + $0x94] ss:$8 sps:$4 sm:$0xff]  }
  0x8d   :  { %817 = vmatpush1.bf16.msra.mxu0 %v1614_v56  ;;  %848 = vmatprep.mubr.bf16.mxu0 %v1706_v57  ;;  %v1711_v56 = vld [vmem:[#allocation5 + $0x304] ss:$8 sps:$4 sm:$0xff]   ;;  %v1747_v57 = vld [vmem:[#allocation7 + $0x90] ss:$8 sps:$4 sm:$0xff]  }
  0x8e   :  { %818 = vmatprep.subr.bf16.mxu0 %v1619_v58  ;;  %v1704_v58 = vld [vmem:[#allocation2 + $0x10] ss:$28 sps:$4 sm:$0xff]  }
  0x8f   :  { %761 = vmatpush1.bf16.msra.mxu1 %v1715_v17 }
  0x90   :  { %1112 = vmatprep.subr.bf16.mxu1 %v1722_v18  ;;  %v189_v18 = vld [vmem:[%s2041_s2] sm:$0x3] }
  0x91   :  { %819 = vmatpush1.bf16.msra.mxu0 %v1617_v61  ;;  %v1750_v61 = vld [vmem:[#allocation7 + $0xa0] ss:$8 sps:$4 sm:$0xff]  }
  0x92   :  { %820 = vmatprep.subr.bf16.mxu0 %v1624_v62  ;;  %763 = vmatmul.mubr.bf16.vlgmr.msra.gmra.mrb[0].mxu1 %v1716_v20  ;;  %v1755_v62 = vld [vmem:[#allocation7 + $0xb4] ss:$8 sps:$4 sm:$0xff]  }
  0x93   :  { %1113 = vmatpush1.bf16.msra.mxu1 %v1720_v21 }
  0x94   :  { %1114 = vmatprep.subr.bf16.mxu1 %v1725_v22 }
  0x95   :  { %821 = vmatpush1.bf16.msra.mxu0 %v1622_v2  ;;  %v1756_v2 = vld [vmem:[#allocation7 + $0xc0] ss:$8 sps:$4 sm:$0xff]  }
  0x96   :  { %822 = vmatprep.subr.bf16.mxu0 %v1630_v3  ;;  %v1719_v3 = vld [vmem:[#allocation2 + $0x18] ss:$28 sps:$4 sm:$0xff]  }
  0x97   :  { %1115 = vmatpush1.bf16.msra.mxu1 %v1723_v25 }
  0x98   :  { %1116 = vmatprep.subr.bf16.mxu1 %v1728_v26 }
  0x99   :  { %823 = vmatpush1.bf16.msra.mxu0 %v1628_v6  ;;  %v1764_v6 = vld [vmem:[#allocation7 + $0xe4] ss:$8 sps:$4 sm:$0xff]  }
  0x9a   :  { %824 = vmatprep.subr.bf16.mxu0 %v1636_v7  ;;  %v1762_v7 = vld [vmem:[#allocation7 + $0xe0] ss:$8 sps:$4 sm:$0xff]  }
  0x9b   :  { %1117 = vmatpush1.bf16.msra.mxu1 %v1726_v29 }
  0x9c   :  { %1118 = vmatprep.subr.bf16.mxu1 %v1731_v30 }
  0x9d   :  { %825 = vmatpush1.bf16.msra.mxu0 %v1634_v10  ;;  %v1768_v10 = vld [vmem:[#allocation8 + $0x40] sm:$0xff]  }
  0x9e   :  { %826 = vmatprep.subr.bf16.mxu0 %v1642_v11 }
  0x9f   :  { %1119 = vmatpush1.bf16.msra.mxu1 %v1729_v33 }
  0xa0   :  { %1120 = vmatprep.subr.bf16.mxu1 %v1734_v34 }
  0xa1   :  { %827 = vmatpush1.bf16.msra.mxu0 %v1640_v14 }
  0xa2   :  { %828 = vmatprep.subr.bf16.mxu0 %v1648_v15  ;;  %v191_v15 = vlaneseq }
  0xa3   :  { %1121 = vmatpush1.bf16.msra.mxu1 %v1732_v37 }
  0xa4   :  { %1122 = vmatprep.subr.bf16.mxu1 %v1737_v38 }
  0xa5   :  { %829 = vmatpush1.bf16.msra.mxu0 %v1646_v16  ;;  %v192_v16 = vshrl.u32 %v191_v15, 7 }
  0xa6   :  { %830 = vmatprep.subr.bf16.mxu0 %v1654_v19 }
  0xa7   :  { %1123 = vmatpush1.bf16.msra.mxu1 %v1735_v41  ;;  %v193_v17 = vsub.s32 0, %v192_v16  ;;  %v197_v19 = vsub.s32 1, %v192_v16  ;;  %v1770_v41 = vld [vmem:[#allocation8 + $0x48] sm:$0xff]  }
  0xa8   :  { %1124 = vmatprep.subr.bf16.mxu1 %v1740_v42  ;;  %v1771_v42 = vld [vmem:[#allocation8 + $0x8] sm:$0xff]  }
  0xa9   :  { %831 = vmatpush1.bf16.msra.mxu0 %v1652_v23  ;;  %v194_v20 = vrot.slane %v189_v18, %v193_v17  ;;  %v198_v21 = vrot.slane %v189_v18, %v197_v19 }
  0xaa   :  { %832 = vmatprep.subr.bf16.mxu0 %v1660_v24 }
  0xab   :  { %1125 = vmatpush1.bf16.msra.mxu1 %v1738_v45  ;;  %v1774_v45 = vld [vmem:[#allocation8 + $0x58] sm:$0xff]  }
  0xac   :  { %1126 = vmatprep.subr.bf16.mxu1 %v1743_v46  ;;  %v1775_v46 = vld [vmem:[#allocation8 + $0x18] sm:$0xff]  }
  0xad   :  { %833 = vmatpush1.bf16.msra.mxu0 %v1658_v27 }
  0xae   :  { %834 = vmatprep.subr.bf16.mxu0 %v1666_v28 }
  0xaf   :  { %1127 = vmatpush1.bf16.msra.mxu1 %v1741_v49  ;;  %v1778_v49 = vld [vmem:[#allocation8 + $0x68] sm:$0xff]  }
  0xb0   :  { %1128 = vmatprep.subr.bf16.mxu1 %v1746_v50  ;;  %v1779_v50 = vld [vmem:[#allocation8 + $0x28] sm:$0xff]  }
  0xb1   :  { %835 = vmatpush1.bf16.msra.mxu0 %v1664_v31 }
  0xb2   :  { %836 = vmatprep.subr.bf16.mxu0 %v1672_v32 }
  0xb3   :  { %1129 = vmatpush1.bf16.msra.mxu1 %v1744_v53  ;;  %v1782_v53 = vld [vmem:[#allocation8 + $0x78] sm:$0xff]  }
  0xb4   :  { %1130 = vmatprep.subr.bf16.mxu1 %v1749_v54  ;;  %v1783_v54 = vld [vmem:[#allocation8 + $0x38] sm:$0xff]  }
  0xb5   :  { %837 = vmatpush1.bf16.msra.mxu0 %v1670_v35 }
  0xb6   :  { %838 = vmatprep.subr.bf16.mxu0 %v1678_v36 }
  0xb7   :  { %1131 = vmatpush1.bf16.msra.mxu1 %v1747_v57 }
  0xb8   :  { %1132 = vmatprep.subr.bf16.mxu1 %v1752_v59 }
  0xb9   :  { %839 = vmatpush1.bf16.msra.mxu0 %v1676_v39 }
  0xba   :  { %840 = vmatprep.subr.bf16.mxu0 %v1684_v40  ;;  %v1769_v40 = vld [vmem:[#allocation8] sm:$0xff]  }
  0xbb   :  { %1133 = vmatpush1.bf16.msra.mxu1 %v1750_v61 }
  0xbc   :  { %1134 = vmatprep.subr.bf16.mxu1 %v1755_v62 }
  0xbd   :  { %841 = vmatpush1.bf16.msra.mxu0 %v1682_v43  ;;  %v1772_v43 = vld [vmem:[#allocation8 + $0x50] sm:$0xff]  }
  0xbe   :  { %842 = vmatprep.subr.bf16.mxu0 %v1690_v44  ;;  %v1773_v44 = vld [vmem:[#allocation8 + $0x10] sm:$0xff]  }
  0xbf   :  { %1135 = vmatpush1.bf16.msra.mxu1 %v1753_v0 }
  0xc0   :  { %1136 = vmatprep.subr.bf16.mxu1 %v1758_v1 }
  0xc1   :  { %843 = vmatpush1.bf16.msra.mxu0 %v1688_v47  ;;  %v1776_v47 = vld [vmem:[#allocation8 + $0x60] sm:$0xff]  }
  0xc2   :  { %844 = vmatprep.subr.bf16.mxu0 %v1696_v48  ;;  %v1777_v48 = vld [vmem:[#allocation8 + $0x20] sm:$0xff]  }
  0xc3   :  { %1137 = vmatpush1.bf16.msra.mxu1 %v1756_v2 }
  0xc4   :  { %1138 = vmatprep.subr.bf16.mxu1 %v1761_v5 }
  0xc5   :  { %845 = vmatpush1.bf16.msra.mxu0 %v1694_v51  ;;  %v1780_v51 = vld [vmem:[#allocation8 + $0x70] sm:$0xff]  }
  0xc6   :  { %846 = vmatprep.subr.bf16.mxu0 %v1702_v52  ;;  %v1781_v52 = vld [vmem:[#allocation8 + $0x30] sm:$0xff]  }
  0xc7   :  { %1139 = vmatpush1.bf16.msra.mxu1 %v1759_v4 }
  0xc8   :  { %1140 = vmatprep.subr.bf16.mxu1 %v1764_v6 }
  0xc9   :  { %847 = vmatpush1.bf16.msra.mxu0 %v1700_v55  ;;  %v940_v55 = vld [vmem:[%s2043_s4] sm:$0x3] }
  0xca   :  { %859 = vmatprep.subr.bf16.mxu0 %v1711_v56  ;;  %v945_v56 = vrot.slane %v940_v55, %v193_v17  ;;  %v949_v57 = vrot.slane %v940_v55, %v197_v19 }
  0xcb   :  { %1141 = vmatpush1.bf16.msra.mxu1 %v1762_v7 }
  0xcc   :  { %849 = vmatmul.mubr.bf16.vlgmr.msra.gmra.mrb[0].mxu0 %v1704_v58  ;;  %1142 = vmatprep.subr.bf16.mxu1 %v1767_v8 }
  0xcd   :  { %860 = vmatpush1.bf16.msra.mxu0 %v1709_v60  ;;  %891 = vmatprep.mubr.bf16.mxu0 %v1912_v63 }
  0xcf   :  { %1143 = vmatpush1.bf16.msra.mxu1 %v1765_v9  ;;  %v1496_v9 = vld [vmem:[%s2045_s6] ss:$0 sm:$0xff] }
  0xd0   :  { %1513 = vmatprep.subr.bf16.mxu1 %v1768_v10 }
  0xd8   :  { %1463 = vmatmul.mubr.msk.bf16.vlgmr.msra.gmra.mrb[0].mxu0 %vm726_vm0, %v1719_v3 }
 0x165   :  { %v764_v11 = vpop.f32.mrb[0].mxu1 }
 0x166   :  { %v766_v12 = vpop.f32.mrb[1].mxu1  ;;  %v765_v22 = vadd.f32 %v764_v11, %v194_v20 }
 0x167   :  { %v768_v13 = vpop.f32.mrb[2].mxu1  ;;  %v767_v23 = vadd.f32 %v766_v12, %v198_v21 }
 0x168   :  { %v770_v14 = vpop.f32.mrb[3].mxu1  ;;  %v769_v25 = vadd.f32 %v768_v13, %v194_v20 }
 0x169   :  { %v771_v28 = vadd.f32 %v770_v14, %v198_v21 }
 0x1ab   :  { %v893_v24 = vpop.f32.mrb[0].mxu0 }
 0x1ac   :  { %v1536_v26 = vadd.f32 %v893_v24, %v765_v22  ;;  %v895_v27 = vpop.f32.mrb[1].mxu0 }
 0x1ad   :  { %v1538_v29 = vadd.f32 %v895_v27, %v767_v23  ;;  %v897_v30 = vpop.f32.mrb[2].mxu0 }
 0x1ae   :  { %v1540_v31 = vadd.f32 %v897_v30, %v769_v25  ;;  %v899_v32 = vpop.f32.mrb[3].mxu0  ;;  %v902_v34 = vmax.f32 %v1536_v26, 0.0 }
 0x1af   :  { %v1542_v33 = vadd.f32 %v899_v32, %v771_v28  ;;  %v903_v36 = vmax.f32 %v1538_v29, 0.0 }
 0x1b0   :  { %v904_v35 = vmax.f32 %v1540_v31, 0.0 }
 0x1b1   :  { %v905_v37 = vmax.f32 %v1542_v33, 0.0 }
 0x1b2   :  { %v906_v38 = vpack.c.bf16 %v904_v35, %v902_v34 }
 0x1b3   :  { %v907_v39 = vpack.c.bf16 %v905_v37, %v903_v36 }
 0x1b5   :  { %1144 = vmatprep.mubr.bf16.mxu1 %v907_v39 }
 0x1b6   :  { %1145 = vmatmul.mubr.bf16.vlgmr.msra.gmra.mrb[4].mxu1 %v906_v38 }
 0x1b7   :  { %1514 = vmatpush3.bf16.msra.mxu1 %v1769_v40 }
 0x1b8   :  { %1515 = vmatprep.subr.bf16.mxu1 %v1770_v41 }
 0x1bb   :  { %1516 = vmatpush3.bf16.msra.mxu1 %v1771_v42 }
 0x1bc   :  { %1517 = vmatprep.subr.bf16.mxu1 %v1772_v43 }
 0x1bf   :  { %1518 = vmatpush3.bf16.msra.mxu1 %v1773_v44 }
 0x1c0   :  { %1519 = vmatprep.subr.bf16.mxu1 %v1774_v45 }
 0x1c3   :  { %1520 = vmatpush3.bf16.msra.mxu1 %v1775_v46 }
 0x1c4   :  { %1521 = vmatprep.subr.bf16.mxu1 %v1776_v47 }
 0x1c7   :  { %1522 = vmatpush3.bf16.msra.mxu1 %v1777_v48 }
 0x1c8   :  { %1523 = vmatprep.subr.bf16.mxu1 %v1778_v49 }
 0x1cb   :  { %1524 = vmatpush3.bf16.msra.mxu1 %v1779_v50 }
 0x1cc   :  { %1525 = vmatprep.subr.bf16.mxu1 %v1780_v51 }
 0x1cf   :  { %1526 = vmatpush3.bf16.msra.mxu1 %v1781_v52 }
 0x1d0   :  { %1527 = vmatprep.subr.bf16.mxu1 %v1782_v53 }
 0x1d3   :  { %1528 = vmatpush3.bf16.msra.mxu1 %v1783_v54 }
 0x289   :  { %v1146_v58 = vpop.f32.mrb[4].mxu1 }
 0x28a   :  { %v1147_v59 = vadd.f32 %v1146_v58, %v945_v56  ;;  %v1148_v60 = vpop.f32.mrb[5].mxu1 }
 0x28b   :  { %v1149_v61 = vadd.f32 %v1148_v60, %v949_v57  ;;  %v1150_v62 = vpop.f32.mrb[6].mxu1 }
 0x28c   :  { %v1151_v63 = vadd.f32 %v1150_v62, %v945_v56  ;;  %v1152_v0 = vpop.f32.mrb[7].mxu1  ;;  %v1155_v2 = vmax.f32 %v1147_v59, 0.0 }
 0x28d   :  { %v1153_v1 = vadd.f32 %v1152_v0, %v949_v57  ;;  %v1156_v4 = vmax.f32 %v1149_v61, 0.0 }
 0x28e   :  { %v1157_v3 = vmax.f32 %v1151_v63, 0.0 }
 0x28f   :  { %v1158_v5 = vmax.f32 %v1153_v1, 0.0 }
 0x290   :  { %v1159_v6 = vpack.c.bf16 %v1157_v3, %v1155_v2 }
 0x291   :  { %v1160_v7 = vpack.c.bf16 %v1158_v5, %v1156_v4 }
 0x293   :  { %1328 = vmatprep.mubr.bf16.mxu1 %v1160_v7 }
 0x294   :  { %1329 = vmatmul.mubr.bf16.vlgmr.msra.gmra.mrb[8].mxu1 %v1159_v6 }
 0x367   :  { %v1529_v8 = vpop.f32.mrb[8].mxu1 }
 0x368   :  { %v1530_v10 = vpop.f32.mrb[9].mxu1 }
 0x369   :  { %v1531_v11 = vadd.f32 %v1530_v10, %v1529_v8  ;;  %v1532_v12 = vpop.f32.mrb[10].mxu1 }
 0x36a   :  { %v1533_v13 = vpop.f32.mrb[11].mxu1 }
 0x36b   :  { %v1331_v14 = vadd.f32 %v1531_v11, %v1496_v9  ;;  %v1534_v15 = vadd.f32 %v1533_v13, %v1532_v12 }
 0x36d   :  { %1337 = vst [vmem:[#allocation10] sm:$0xff] %v1331_v14  ;;  %v1334_v16 = vadd.f32 %v1534_v15, %v1496_v9 }
 0x36f   :  { %1338 = vst [vmem:[#allocation10 + $0x8] sm:$0xff] %v1334_v16 }
 0x370   :  { %1883 = shalt.err (!%p1880_p8)
}
 0x371   :  { %s1884_s17 = scalar_lea.hbm %s2046_s7, 256 }
 0x372   :  { %p1885_p9 = scmp.ne.s32.totalorder %s2046_s7, %s1884_s17  ;;  %p1888_p10 = scmp.lt.u32.totalorder %s1884_s17, %s2046_s7 }
 0x374   :  { %p1890_p11 = pnand %p1888_p10, %p1885_p9 }
 0x376   :  { %1893 = shalt.err (!%p1890_p11)
}
 0x377   :  { %1350 = dma.vmem_to_hbm [thread:$0]  %s1345_s13, 256, %s2046_s7, [#allocation4], %s1903_s11, %s1903_s11, %s1904_s12  }
 0x378   :  { %1900 = dma.done.wait [#allocation4], 256  }
 0x379   :  { %1901 = vsyncadd [#allocation4], 4294967040 }
 0x37a   :  { %1354 = vsyncpa [#allocation3], 1 }
 0x37b   :  { %1355 = vsyncpa [#allocation6], 1 }
 0x37c   :  { %1356 = vsyncpa [#allocation9], 1 }
 0x37d   :  { %1357 = vsyncpa [#allocation4], 1 }

</bundles_post_ra>
